<compile_context>
chip_gen: v7x
topology: tpu7x:2x2x1
jax: 0.10.0
libtpu: 0.0.40
codegen_flags: <defaults>
</compile_context>

<pallas_src>
from functools import partial

import jax
import jax.numpy as jnp
from jax.experimental import pallas as pl
from jax.experimental.pallas import tpu as pltpu

LANE = 128
SUBLANE = 8


def _round_up(v, m):
    return ((v + m - 1) // m) * m


# ----------------------------------------------------------------------------- kernel
def fused_sage_encoder_kernel(a0_ref, d0_ref, x_ref, wl0_ref, wr0_ref, b0_ref,
                              a1_ref, d1_ref, wl1_ref, wr1_ref, b1_ref,
                              o_ref):
    """Two fused SAGEConv layers (+ReLU).  Whole problem resident in VMEM.

    a0_ref : (Nd0p, Ns0p) bf16  unnormalized edge-count adjacency, layer 0
    d0_ref : (Nd0p, 1)    f32   1/deg per destination row, layer 0
    x_ref  : (Ns0p, Cp)   bf16  input features (lane-padded)
    wl0/wr0: (Cp, Hp)     bf16  lin_l / lin_r weights, layer 0 (zero-padded)
    b0_ref : (1, Hp)      f32
    a1_ref : (Nd1p, Nd0p) bf16  adjacency layer 1 (cols padded to Nd0p with zeros)
    d1_ref : (Nd1p, 1)    f32
    wl1/wr1: (Hp, Op)     bf16
    b1_ref : (1, Op)      f32
    o_ref  : (Nd1p, Op)   f32   rows >= Nd1 / lanes >= Cout are padding
    """
    nd0p = a0_ref.shape[0]
    nd1p = o_ref.shape[0]
    cdt = x_ref.dtype

    # ----- layer 0: SAGEConv(in_channels -> 2*out_channels) + ReLU ------------------
    agg0 = jnp.dot(a0_ref[...], x_ref[...], preferred_element_type=jnp.float32)
    agg0 = agg0 * d0_ref[...]                       # mean: f32 1/deg after f32 accum
    xt0 = x_ref[:nd0p, :]                           # x_target = first Nd0p source rows
    h0 = (jnp.dot(agg0.astype(cdt), wl0_ref[...], preferred_element_type=jnp.float32)
          + jnp.dot(xt0, wr0_ref[...], preferred_element_type=jnp.float32))
    h0 = jnp.maximum(h0 + b0_ref[...], 0.0).astype(cdt)   # stays in vregs, no VMEM trip

    # ----- layer 1: SAGEConv(2*out_channels -> out_channels) + ReLU -----------------
    agg1 = jnp.dot(a1_ref[...], h0, preferred_element_type=jnp.float32)
    agg1 = agg1 * d1_ref[...]
    xt1 = h0[:nd1p, :]
    h1 = (jnp.dot(agg1.astype(cdt), wl1_ref[...], preferred_element_type=jnp.float32)
          + jnp.dot(xt1, wr1_ref[...], preferred_element_type=jnp.float32))
    o_ref[...] = jnp.maximum(h1 + b1_ref[...], 0.0).astype(o_ref.dtype)


# --------------------------------------------------------------------------- wrappers
def prepare_packed_params(params, compute_dtype=jnp.bfloat16):
    """One-time weight padding/casting (hoisted out of the forward pass)."""
    (Wl0, Wr0, b0), (Wl1, Wr1, b1) = params
    Cin, H = Wl0.shape
    H2, Cout = Wl1.shape
    assert H2 == H
    Cp = _round_up(Cin, LANE)
    Hp = _round_up(H, LANE)
    Op = _round_up(Cout, LANE)

    def pad_w(W, kp, np_):
        K, N = W.shape
        return jnp.zeros((kp, np_), jnp.float32).at[:K, :N].set(W).astype(compute_dtype)

    def pad_b(b, np_):
        return jnp.zeros((1, np_), jnp.float32).at[0, :b.shape[0]].set(b)

    packed = (pad_w(Wl0, Cp, Hp), pad_w(Wr0, Cp, Hp), pad_b(b0, Hp),
              pad_w(Wl1, Hp, Op), pad_w(Wr1, Hp, Op), pad_b(b1, Op))
    return packed, Cout


def _build_padded_adj(edge_index, nd_pad, ns_pad, compute_dtype):
    """Edge-count adjacency built directly at padded shape + f32 inverse degree."""
    src, dst = edge_index[0], edge_index[1]
    A = jnp.zeros((nd_pad, ns_pad), jnp.float32).at[dst, src].add(1.0)
    inv_deg = 1.0 / jnp.maximum(jnp.sum(A, axis=1, keepdims=True), 1.0)
    return A.astype(compute_dtype), inv_deg


@partial(jax.jit, static_argnames=("Ns0", "Nd0", "Ns1", "Nd1", "Cout"))
def _encoder_forward_impl(x, e0, e1, wl0, wr0, b0, wl1, wr1, b1,
                          *, Ns0, Nd0, Ns1, Nd1, Cout):
    compute_dtype = wl0.dtype
    Cin = x.shape[1]
    Cp = wl0.shape[0]
    Op = wl1.shape[1]

    Ns0p = _round_up(Ns0, SUBLANE)
    Nd0p = _round_up(Nd0, SUBLANE)
    Nd1p = _round_up(Nd1, SUBLANE)

    A0, inv_d0 = _build_padded_adj(e0, Nd0p, Ns0p, compute_dtype)
    # Layer-1 columns padded to Nd0p so padded/stale h0 rows multiply zero columns.
    A1, inv_d1 = _build_padded_adj(e1, Nd1p, Nd0p, compute_dtype)

    xp = jnp.zeros((Ns0p, Cp), jnp.float32).at[:Ns0, :Cin].set(x).astype(compute_dtype)

    vmem = pl.BlockSpec(memory_space=pltpu.MemorySpace.VMEM)
    out = pl.pallas_call(
        fused_sage_encoder_kernel,
        out_shape=jax.ShapeDtypeStruct((Nd1p, Op), jnp.float32),
        in_specs=[vmem] * 11,
        out_specs=vmem,
    )(A0, inv_d0, xp, wl0, wr0, b0, A1, inv_d1, wl1, wr1, b1)

    return out[:Nd1, :Cout]


def encoder_forward(x, adjs, packed_params, out_channels):
    """Encoder.forward for k=2, fused into one Pallas kernel call."""
    (e0, (Ns0, Nd0)), (e1, (Ns1, Nd1)) = adjs
    # Neighbor-sampler invariant: layer-1 sources are drawn from layer-0 destinations.
    assert Ns1 <= Nd0, "layer-1 source count must not exceed layer-0 destination count"
    return _encoder_forward_impl(x, e0, e1, *packed_params,
                                 Ns0=Ns0, Nd0=Nd0, Ns1=Ns1, Nd1=Nd1, Cout=out_channels)


def encoder_forward_ref(x, adjs, params):
    """Pure-JAX f32 reference with identical semantics (correctness check)."""
    for (edge_index, (Ns, Nd)), (Wl, Wr, b) in zip(adjs, params):
        src, dst = edge_index[0], edge_index[1]
        A = jnp.zeros((Nd, Ns), jnp.float32).at[dst, src].add(1.0)
        deg = jnp.maximum(jnp.sum(A, axis=1, keepdims=True), 1.0)
        agg = (A @ x) / deg
        x = jnp.maximum(agg @ Wl + x[:Nd] @ Wr + b, 0.0)
    return x


def init_sage_params(key, cin, cout):
    k1, k2, k3 = jax.random.split(key, 3)
    scale = 1.0 / jnp.sqrt(jnp.float32(cin))
    Wl = jax.random.uniform(k1, (cin, cout), jnp.float32, -scale, scale)
    Wr = jax.random.uniform(k2, (cin, cout), jnp.float32, -scale, scale)
    b = jax.random.uniform(k3, (cout,), jnp.float32, -scale, scale)
    return (Wl, Wr, b)


if __name__ == "__main__":
    key = jax.random.PRNGKey(0)

    # Encoder hyperparams (k=2): in_channels=16, out_channels(num_hidden)=32
    in_channels = 16
    out_channels = 32

    # Layer 0: 16 source nodes -> 8 target nodes ; Layer 1: 8 -> 4
    Ns0, Nd0 = 16, 8
    Ns1, Nd1 = 8, 4
    E0, E1 = 32, 16

    k_x, k_e0s, k_e0d, k_e1s, k_e1d, k_p0, k_p1 = jax.random.split(key, 7)

    x = jax.random.normal(k_x, (Ns0, in_channels), jnp.float32)

    edge_index0 = jnp.stack([
        jax.random.randint(k_e0s, (E0,), 0, Ns0),
        jax.random.randint(k_e0d, (E0,), 0, Nd0),
    ]).astype(jnp.int32)
    edge_index1 = jnp.stack([
        jax.random.randint(k_e1s, (E1,), 0, Ns1),
        jax.random.randint(k_e1d, (E1,), 0, Nd1),
    ]).astype(jnp.int32)

    # adjs mimics NeighborSampler output: list of (edge_index, size=(num_src, num_dst))
    adjs = [
        (edge_index0, (Ns0, Nd0)),
        (edge_index1, (Ns1, Nd1)),
    ]

    # conv[0]: in_channels -> 2*out_channels ; conv[1]: 2*out_channels -> out_channels
    params = [
        init_sage_params(k_p0, in_channels, 2 * out_channels),
        init_sage_params(k_p1, 2 * out_channels, out_channels),
    ]

    # One-time weight packing/padding (hoisted out of the forward pass).
    packed_params, cout = prepare_packed_params(params)

    out = encoder_forward(x, adjs, packed_params, cout)
    jax.block_until_ready(out)

    assert out.shape == (Nd1, out_channels)
    assert out.dtype == jnp.float32

    # Correctness check against the pure-JAX f32 reference (bf16 MXU operand tolerance).
    ref = encoder_forward_ref(x, adjs, params)
    max_err = float(jnp.max(jnp.abs(out - ref)))
    assert max_err < 5e-2, f"max abs err vs reference: {max_err}"

    # TODO(synk): Model.loss / projection / semi_loss are not part of Model.forward and are omitted.
    print("KERNEL_OK")
</pallas_src>

<mosaic_0001>
module attributes {stable_mosaic.version = 11 : i64} {
  func.func private @main(%arg0: i32) attributes {dimension_semantics = [#tpu.dimension_semantics<core_parallel>], iteration_bounds = array<i64: 2>, tpu.core_type = #tpu.core_type<sc_scalar_subcore>, window_params = []} {
    return
  }
}

module attributes {stable_mosaic.version = 11 : i64} {
  func.func private @main(%arg0: i32) attributes {dimension_semantics = [#tpu.dimension_semantics<core_parallel>], iteration_bounds = array<i64: 2>, tpu.core_type = #tpu.core_type<sc_scalar_subcore>, window_params = []} {
    return
  }
}

module attributes {stable_mosaic.version = 11 : i64} {
  func.func @fused_sage_encoder_kernel(%arg0: memref<8x16xbf16, #tpu.memory_space<vmem>>, %arg1: memref<8x1xf32, #tpu.memory_space<vmem>>, %arg2: memref<16x128xbf16, #tpu.memory_space<vmem>>, %arg3: memref<128x128xbf16, #tpu.memory_space<vmem>>, %arg4: memref<128x128xbf16, #tpu.memory_space<vmem>>, %arg5: memref<1x128xf32, #tpu.memory_space<vmem>>, %arg6: memref<8x8xbf16, #tpu.memory_space<vmem>>, %arg7: memref<8x1xf32, #tpu.memory_space<vmem>>, %arg8: memref<128x128xbf16, #tpu.memory_space<vmem>>, %arg9: memref<128x128xbf16, #tpu.memory_space<vmem>>, %arg10: memref<1x128xf32, #tpu.memory_space<vmem>>, %arg11: memref<8x128xf32, #tpu.memory_space<vmem>>) attributes {dimension_semantics = [], scalar_prefetch = 0 : i64, scratch_operands = 0 : i64, tpu.core_type = #tpu.core_type<tc>} {
    %c0 = arith.constant 0 : index
    %c0_0 = arith.constant 0 : index
    %0 = vector.load %arg0[%c0, %c0_0] : memref<8x16xbf16, #tpu.memory_space<vmem>>, vector<8x16xbf16>
    %c0_1 = arith.constant 0 : index
    %c0_2 = arith.constant 0 : index
    %1 = vector.load %arg2[%c0_1, %c0_2] : memref<16x128xbf16, #tpu.memory_space<vmem>>, vector<16x128xbf16>
    %cst = arith.constant dense<0.000000e+00> : vector<8x128xf32>
    %2 = tpu.matmul %0, %1, %cst {dimension_numbers = #tpu.dot_dimension_numbers<[1], [0], [0], [1], [0, 0, 1, 1], [], []>} : vector<8x16xbf16>, vector<16x128xbf16>, vector<8x128xf32> -> vector<8x128xf32>
    %c0_3 = arith.constant 0 : index
    %c0_4 = arith.constant 0 : index
    %3 = vector.load %arg1[%c0_3, %c0_4] : memref<8x1xf32, #tpu.memory_space<vmem>>, vector<8x1xf32>
    %4 = vector.broadcast %3 : vector<8x1xf32> to vector<8x128xf32>
    %5 = arith.mulf %2, %4 : vector<8x128xf32>
    %c0_5 = arith.constant 0 : index
    %c0_6 = arith.constant 0 : index
    %6 = vector.load %arg2[%c0_5, %c0_6] : memref<16x128xbf16, #tpu.memory_space<vmem>>, vector<8x128xbf16>
    %7 = arith.truncf %5 : vector<8x128xf32> to vector<8x128xbf16>
    %c0_7 = arith.constant 0 : index
    %c0_8 = arith.constant 0 : index
    %8 = vector.load %arg3[%c0_7, %c0_8] : memref<128x128xbf16, #tpu.memory_space<vmem>>, vector<128x128xbf16>
    %cst_9 = arith.constant dense<0.000000e+00> : vector<8x128xf32>
    %9 = tpu.matmul %7, %8, %cst_9 {dimension_numbers = #tpu.dot_dimension_numbers<[1], [0], [0], [1], [0, 0, 1, 1], [], []>} : vector<8x128xbf16>, vector<128x128xbf16>, vector<8x128xf32> -> vector<8x128xf32>
    %c0_10 = arith.constant 0 : index
    %c0_11 = arith.constant 0 : index
    %10 = vector.load %arg4[%c0_10, %c0_11] : memref<128x128xbf16, #tpu.memory_space<vmem>>, vector<128x128xbf16>
    %cst_12 = arith.constant dense<0.000000e+00> : vector<8x128xf32>
    %11 = tpu.matmul %6, %10, %cst_12 {dimension_numbers = #tpu.dot_dimension_numbers<[1], [0], [0], [1], [0, 0, 1, 1], [], []>} : vector<8x128xbf16>, vector<128x128xbf16>, vector<8x128xf32> -> vector<8x128xf32>
    %12 = arith.addf %9, %11 : vector<8x128xf32>
    %c0_13 = arith.constant 0 : index
    %c0_14 = arith.constant 0 : index
    %13 = vector.load %arg5[%c0_13, %c0_14] : memref<1x128xf32, #tpu.memory_space<vmem>>, vector<1x128xf32>
    %14 = vector.broadcast %13 : vector<1x128xf32> to vector<8x128xf32>
    %15 = arith.addf %12, %14 : vector<8x128xf32>
    %cst_15 = arith.constant 0.000000e+00 : f32
    %16 = vector.broadcast %cst_15 : f32 to vector<8x128xf32>
    %17 = arith.maximumf %15, %16 : vector<8x128xf32>
    %18 = arith.truncf %17 : vector<8x128xf32> to vector<8x128xbf16>
    %c0_16 = arith.constant 0 : index
    %c0_17 = arith.constant 0 : index
    %19 = vector.load %arg6[%c0_16, %c0_17] : memref<8x8xbf16, #tpu.memory_space<vmem>>, vector<8x8xbf16>
    %cst_18 = arith.constant dense<0.000000e+00> : vector<8x128xf32>
    %20 = tpu.matmul %19, %18, %cst_18 {dimension_numbers = #tpu.dot_dimension_numbers<[1], [0], [0], [1], [0, 0, 1, 1], [], []>} : vector<8x8xbf16>, vector<8x128xbf16>, vector<8x128xf32> -> vector<8x128xf32>
    %c0_19 = arith.constant 0 : index
    %c0_20 = arith.constant 0 : index
    %21 = vector.load %arg7[%c0_19, %c0_20] : memref<8x1xf32, #tpu.memory_space<vmem>>, vector<8x1xf32>
    %22 = vector.broadcast %21 : vector<8x1xf32> to vector<8x128xf32>
    %23 = arith.mulf %20, %22 : vector<8x128xf32>
    %24 = arith.truncf %23 : vector<8x128xf32> to vector<8x128xbf16>
    %c0_21 = arith.constant 0 : index
    %c0_22 = arith.constant 0 : index
    %25 = vector.load %arg8[%c0_21, %c0_22] : memref<128x128xbf16, #tpu.memory_space<vmem>>, vector<128x128xbf16>
    %cst_23 = arith.constant dense<0.000000e+00> : vector<8x128xf32>
    %26 = tpu.matmul %24, %25, %cst_23 {dimension_numbers = #tpu.dot_dimension_numbers<[1], [0], [0], [1], [0, 0, 1, 1], [], []>} : vector<8x128xbf16>, vector<128x128xbf16>, vector<8x128xf32> -> vector<8x128xf32>
    %c0_24 = arith.constant 0 : index
    %c0_25 = arith.constant 0 : index
    %27 = vector.load %arg9[%c0_24, %c0_25] : memref<128x128xbf16, #tpu.memory_space<vmem>>, vector<128x128xbf16>
    %cst_26 = arith.constant dense<0.000000e+00> : vector<8x128xf32>
    %28 = tpu.matmul %18, %27, %cst_26 {dimension_numbers = #tpu.dot_dimension_numbers<[1], [0], [0], [1], [0, 0, 1, 1], [], []>} : vector<8x128xbf16>, vector<128x128xbf16>, vector<8x128xf32> -> vector<8x128xf32>
    %29 = arith.addf %26, %28 : vector<8x128xf32>
    %c0_27 = arith.constant 0 : index
    %c0_28 = arith.constant 0 : index
    %30 = vector.load %arg10[%c0_27, %c0_28] : memref<1x128xf32, #tpu.memory_space<vmem>>, vector<1x128xf32>
    %31 = vector.broadcast %30 : vector<1x128xf32> to vector<8x128xf32>
    %32 = arith.addf %29, %31 : vector<8x128xf32>
    %cst_29 = arith.constant 0.000000e+00 : f32
    %33 = vector.broadcast %cst_29 : f32 to vector<8x128xf32>
    %34 = arith.maximumf %32, %33 : vector<8x128xf32>
    %c0_30 = arith.constant 0 : index
    %c0_31 = arith.constant 0 : index
    %35 = vector.load %arg11[%c0_30, %c0_31] : memref<8x128xf32, #tpu.memory_space<vmem>>, vector<8x128xf32>
    tpu.vector_store %arg11[%c0_30, %c0_31], %34 {strides = array<i32>} : memref<8x128xf32, #tpu.memory_space<vmem>>, vector<8x128xf32>,
    return
  }
}

</mosaic_0001>

<bundles_post_ra>
// kernel: _encoder_forward_impl.1
= control target key start
LH: loop header
LB: loop body
LE: loop exit
PB: predicated region body
PF: predicated region fallthrough
CT: control target
= control target key end

     0   :  { %v804_v0 = vmov 0.0   ;;  %vm805_vm0 = vmmov 0   ;;  %v806_v3 = vmov 0   ;;  %vm48_vm1 = vcmask 130048   ;;  %s1036_s2 = inlined_call_operand.vmem [shape: bf16[16,128], index: 2, kind: input, shape index: {}]   ;;  %s1037_s0 = inlined_call_operand.vmem [shape: bf16[8,16], index: 0, kind: input, shape index: {}]   ;;  %s1038_s1 = inlined_call_operand.vmem [shape: f32[8,1], index: 1, kind: input, shape index: {}]   ;;  %s1039_s7 = inlined_call_operand.vmem [shape: f32[8,1], index: 7, kind: input, shape index: {}]   ;;  %s1040_s4 = inlined_call_operand.vmem [shape: bf16[128,128], index: 4, kind: input, shape index: {}]   ;;  %s1041_s3 = inlined_call_operand.vmem [shape: bf16[128,128], index: 3, kind: input, shape index: {}]   ;;  %s1042_s9 = inlined_call_operand.vmem [shape: bf16[128,128], index: 9, kind: input, shape index: {}]   ;;  %s1043_s8 = inlined_call_operand.vmem [shape: bf16[128,128], index: 8, kind: input, shape index: {}]   ;;  %s1044_s5 = inlined_call_operand.vmem [shape: f32[1,128], index: 5, kind: input, shape index: {}]   ;;  %s1045_s6 = inlined_call_operand.vmem [shape: bf16[8,8], index: 6, kind: input, shape index: {}]   ;;  %s1046_s10 = inlined_call_operand.vmem [shape: f32[1,128], index: 10, kind: input, shape index: {}]   ;;  %s1047_s11 = inlined_call_operand.vmem [shape: f32[8,128], index: 11, kind: output, shape index: {}]  }
   0x1   :  { %675 = vmatprep.subr.bf16.mxu0 %v804_v0  ;;  %v771_v1 = vld [vmem:[%s1036_s2] sm:$0xff]   ;;  %677 = vmatprep.mubr.msk.bf16.mxu0 %vm805_vm0, %v804_v0  ;;  %v774_v8 = vld [vmem:[%s1040_s4 + $0x8] sm:$0xff]   ;;  %v776_v10 = vld [vmem:[%s1040_s4 + $0x10] sm:$0xff]   ;;  %vm324_vm2 = vcmask 1043456   ;;  %vm320_vm3 = vcmask 64512  }
   0x2   :  { %v39_v2 = vld [vmem:[%s1037_s0] sm:$0xf]  ;;  %770 = vset.pattern.permute.xlu0 %v806_v3  ;;  %681 = vmatprep.subr.bf16.mxu1 %v804_v0  ;;  %v775_v9 = vld [vmem:[%s1041_s3 + $0x8] sm:$0xff]   ;;  %v777_v11 = vld [vmem:[%s1041_s3 + $0x10] sm:$0xff]  }
   0x3   :  { %v92_v4 = vld [vmem:[%s1038_s1] sm:$0xff]  ;;  %676 = vmatpush3.bf16.msra.mxu0 %v771_v1  ;;  %697 = vmatprep.mubr.msk.bf16.mxu1 %vm805_vm0, %v804_v0  ;;  %v778_v12 = vld [vmem:[%s1040_s4 + $0x18] sm:$0xff]   ;;  %v782_v16 = vld [vmem:[%s1040_s4 + $0x28] sm:$0xff]  }
   0x4   :  { %v368_v5 = vld [vmem:[%s1039_s7] sm:$0xff]  ;;  %95 = vperm.xlu0 %770, %v92_v4   ;;  %701 = vmatprep.subr.bf16.mxu0 %v804_v0  ;;  %v779_v13 = vld [vmem:[%s1041_s3 + $0x18] sm:$0xff]   ;;  %v783_v17 = vld [vmem:[%s1041_s3 + $0x28] sm:$0xff]  }
   0x5   :  { %v772_v6 = vld [vmem:[%s1040_s4] sm:$0xff]   ;;  %v784_v18 = vld [vmem:[%s1040_s4 + $0x30] sm:$0xff]   ;;  %v786_v20 = vld [vmem:[%s1040_s4 + $0x38] sm:$0xff]  }
   0x6   :  { %v773_v7 = vld [vmem:[%s1041_s3] sm:$0xff]   ;;  %682 = vmatpush3.bf16.msra.mxu1 %v772_v6  ;;  %678 = vmatmul.mubr.msk.bf16.vlgmr.msra.gmra.mrb[0].mxu0 %vm48_vm1, %v39_v2  ;;  %v785_v19 = vld [vmem:[%s1041_s3 + $0x30] sm:$0xff]   ;;  %v787_v21 = vld [vmem:[%s1041_s3 + $0x38] sm:$0xff]  }
   0x7   :  { %683 = vmatprep.subr.bf16.mxu1 %v804_v0  ;;  %702 = vmatpush3.bf16.msra.mxu0 %v773_v7  ;;  %v780_v14 = vld [vmem:[%s1040_s4 + $0x20] sm:$0xff]   ;;  %v789_v31 = vld [vmem:[%s1042_s9 + $0x8] sm:$0xff]   ;;  %v790_v32 = vld [vmem:[%s1042_s9 + $0x10] sm:$0xff]  }
   0x8   :  { %371 = vperm.xlu0 %770, %v368_v5   ;;  %703 = vmatprep.subr.bf16.mxu0 %v804_v0  ;;  %v781_v15 = vld [vmem:[%s1041_s3 + $0x20] sm:$0xff]   ;;  %v791_v33 = vld [vmem:[%s1042_s9 + $0x18] sm:$0xff]   ;;  %v793_v35 = vld [vmem:[%s1042_s9 + $0x28] sm:$0xff]  }
   0x9   :  { %717 = vmatprep.mubr.msk.bf16.mxu0 %vm805_vm0, %v804_v0  ;;  %v99_v22 = vld [vmem:[%s1036_s2] sm:$0xf]  ;;  %v794_v40 = vld [vmem:[%s1042_s9 + $0x30] sm:$0xff]   ;;  %v795_v41 = vld [vmem:[%s1042_s9 + $0x38] sm:$0xff]  }
   0xa   :  { %684 = vmatpush3.bf16.msra.mxu1 %v774_v8  ;;  %v788_v28 = vld [vmem:[%s1042_s9] sm:$0xff]   ;;  %v797_v54 = vld [vmem:[%s1043_s8 + $0x8] sm:$0xff]   ;;  %v798_v55 = vld [vmem:[%s1043_s8 + $0x10] sm:$0xff]  }
   0xb   :  { %685 = vmatprep.subr.bf16.mxu1 %v804_v0  ;;  %704 = vmatpush3.bf16.msra.mxu0 %v775_v9  ;;  %v792_v34 = vld [vmem:[%s1042_s9 + $0x20] sm:$0xff]   ;;  %v799_v56 = vld [vmem:[%s1043_s8 + $0x18] sm:$0xff]   ;;  %v801_v58 = vld [vmem:[%s1043_s8 + $0x28] sm:$0xff]  }
   0xc   :  { %705 = vmatprep.subr.bf16.mxu0 %v804_v0  ;;  %v616_v43 = vld [vmem:[%s1044_s5] ss:$0 sm:$0xff]  ;;  %v802_v59 = vld [vmem:[%s1043_s8 + $0x30] sm:$0xff]   ;;  %v803_v60 = vld [vmem:[%s1043_s8 + $0x38] sm:$0xff]  }
   0xd   :  { %v319_v52 = vld [vmem:[%s1045_s6] sm:$0xf] }
   0xe   :  { %686 = vmatpush3.bf16.msra.mxu1 %v776_v10  ;;  %v796_v53 = vld [vmem:[%s1043_s8] sm:$0xff]  }
   0xf   :  { %687 = vmatprep.subr.bf16.mxu1 %v804_v0  ;;  %706 = vmatpush3.bf16.msra.mxu0 %v777_v11  ;;  %v800_v57 = vld [vmem:[%s1043_s8 + $0x20] sm:$0xff]  }
  0x10   :  { %707 = vmatprep.subr.bf16.mxu0 %v804_v0 }
  0x12   :  { %688 = vmatpush3.bf16.msra.mxu1 %v778_v12 }
  0x13   :  { %689 = vmatprep.subr.bf16.mxu1 %v804_v0  ;;  %708 = vmatpush3.bf16.msra.mxu0 %v779_v13 }
  0x14   :  { %709 = vmatprep.subr.bf16.mxu0 %v804_v0 }
  0x16   :  { %690 = vmatpush3.bf16.msra.mxu1 %v780_v14 }
  0x17   :  { %691 = vmatprep.subr.bf16.mxu1 %v804_v0  ;;  %710 = vmatpush3.bf16.msra.mxu0 %v781_v15 }
  0x18   :  { %711 = vmatprep.subr.bf16.mxu0 %v804_v0 }
  0x1a   :  { %692 = vmatpush3.bf16.msra.mxu1 %v782_v16 }
  0x1b   :  { %693 = vmatprep.subr.bf16.mxu1 %v804_v0  ;;  %712 = vmatpush3.bf16.msra.mxu0 %v783_v17 }
  0x1c   :  { %713 = vmatprep.subr.bf16.mxu0 %v804_v0 }
  0x1e   :  { %694 = vmatpush3.bf16.msra.mxu1 %v784_v18 }
  0x1f   :  { %695 = vmatprep.subr.bf16.mxu1 %v804_v0  ;;  %714 = vmatpush3.bf16.msra.mxu0 %v785_v19 }
  0x20   :  { %715 = vmatprep.subr.bf16.mxu0 %v804_v0 }
  0x22   :  { %696 = vmatpush3.bf16.msra.mxu1 %v786_v20 }
  0x23   :  { %721 = vmatprep.subr.bf16.mxu1 %v804_v0  ;;  %716 = vmatpush3.bf16.msra.mxu0 %v787_v21 }
  0x24   :  { %727 = vmatprep.subr.bf16.mxu0 %v804_v0 }
  0x25   :  { %698 = vmatmul.mubr.bf16.vlgmr.msra.gmra.mrb[0].mxu1 %v99_v22 }
  0x26   :  { %723 = vmatprep.mubr.msk.bf16.mxu1 %vm805_vm0, %v804_v0 }
  0x83   :  { %v96_v23 = vpop.permute.xlu0 %95 }
  0x87   :  { %v372_v2 = vpop.permute.xlu0 %371 }
  0xd9   :  { %v86_v24 = vpop.f32.mrb[0].mxu0 }
  0xda   :  { %v98_v25 = vmul.f32 %v96_v23, %v86_v24  ;;  %v679_v26 = vpop.f32.mrb[1].mxu0 }
  0xdb   :  { %v89_v27 = vpop.f32.mrb[2].mxu0 }
  0xdc   :  { %v100_v29 = vpack.c.bf16 %v98_v25, %v98_v25  ;;  %v680_v30 = vpop.f32.mrb[3].mxu0 }
  0xde   :  { %718 = vmatmul.mubr.bf16.vlgmr.msra.gmra.mrb[4].mxu0 %v100_v29 }
  0xdf   :  { %728 = vmatpush3.bf16.msra.mxu0 %v788_v28  ;;  %743 = vmatprep.mubr.msk.bf16.mxu0 %vm805_vm0, %v804_v0 }
  0xe0   :  { %729 = vmatprep.subr.bf16.mxu0 %v804_v0 }
  0xe3   :  { %730 = vmatpush3.bf16.msra.mxu0 %v789_v31 }
  0xe4   :  { %731 = vmatprep.subr.bf16.mxu0 %v804_v0 }
  0xe7   :  { %732 = vmatpush3.bf16.msra.mxu0 %v790_v32 }
  0xe8   :  { %733 = vmatprep.subr.bf16.mxu0 %v804_v0 }
  0xeb   :  { %734 = vmatpush3.bf16.msra.mxu0 %v791_v33 }
  0xec   :  { %735 = vmatprep.subr.bf16.mxu0 %v804_v0 }
  0xef   :  { %736 = vmatpush3.bf16.msra.mxu0 %v792_v34 }
  0xf0   :  { %737 = vmatprep.subr.bf16.mxu0 %v804_v0 }
  0xf3   :  { %738 = vmatpush3.bf16.msra.mxu0 %v793_v35 }
  0xf4   :  { %739 = vmatprep.subr.bf16.mxu0 %v804_v0 }
  0xf7   :  { %740 = vmatpush3.bf16.msra.mxu0 %v794_v40 }
  0xf8   :  { %v215_v36 = vpop.f32.mrb[0].mxu1  ;;  %741 = vmatprep.subr.bf16.mxu0 %v804_v0 }
  0xf9   :  { %v699_v37 = vpop.f32.mrb[1].mxu1 }
  0xfa   :  { %v218_v38 = vpop.f32.mrb[2].mxu1 }
  0xfb   :  { %v700_v39 = vpop.f32.mrb[3].mxu1  ;;  %742 = vmatpush3.bf16.msra.mxu0 %v795_v41 }
 0x1b1   :  { %v303_v42 = vpop.f32.mrb[4].mxu0 }
 0x1b2   :  { %v304_v44 = vadd.f32 %v303_v42, %v215_v36  ;;  %v719_v45 = vpop.f32.mrb[5].mxu0 }
 0x1b3   :  { %v306_v46 = vpop.f32.mrb[6].mxu0 }
 0x1b4   :  { %v316_v47 = vadd.f32 %v616_v43, %v304_v44  ;;  %v720_v48 = vpop.f32.mrb[7].mxu0 }
 0x1b6   :  { %v317_v49 = vmax.f32 %v316_v47, 0.0 }
 0x1b8   :  { %v318_v50 = vpack.c.bf16 %v317_v49, %v317_v49 }
 0x1ba   :  { %744 = vmatmul.mubr.bf16.vlgmr.msra.gmra.mrb[8].mxu0 %v318_v50  ;;  %v326_v51 = vsel %vm324_vm2, %v318_v50, 0 }
 0x1bb   :  { %722 = vmatpush3.bf16.msra.mxu1 %v326_v51 }
 0x1bc   :  { %747 = vmatprep.subr.bf16.mxu1 %v804_v0 }
 0x1be   :  { %724 = vmatmul.mubr.msk.bf16.vlgmr.msra.gmra.mrb[4].mxu1 %vm320_vm3, %v319_v52 }
 0x1bf   :  { %748 = vmatpush3.bf16.msra.mxu1 %v796_v53  ;;  %763 = vmatprep.mubr.msk.bf16.mxu1 %vm805_vm0, %v804_v0 }
 0x1c0   :  { %749 = vmatprep.subr.bf16.mxu1 %v804_v0 }
 0x1c3   :  { %750 = vmatpush3.bf16.msra.mxu1 %v797_v54 }
 0x1c4   :  { %751 = vmatprep.subr.bf16.mxu1 %v804_v0 }
 0x1c7   :  { %752 = vmatpush3.bf16.msra.mxu1 %v798_v55 }
 0x1c8   :  { %753 = vmatprep.subr.bf16.mxu1 %v804_v0 }
 0x1cb   :  { %754 = vmatpush3.bf16.msra.mxu1 %v799_v56 }
 0x1cc   :  { %755 = vmatprep.subr.bf16.mxu1 %v804_v0 }
 0x1cf   :  { %756 = vmatpush3.bf16.msra.mxu1 %v800_v57 }
 0x1d0   :  { %757 = vmatprep.subr.bf16.mxu1 %v804_v0 }
 0x1d3   :  { %758 = vmatpush3.bf16.msra.mxu1 %v801_v58 }
 0x1d4   :  { %759 = vmatprep.subr.bf16.mxu1 %v804_v0 }
 0x1d7   :  { %760 = vmatpush3.bf16.msra.mxu1 %v802_v59 }
 0x1d8   :  { %761 = vmatprep.subr.bf16.mxu1 %v804_v0  ;;  %v634_v0 = vld [vmem:[%s1046_s10] ss:$0 sm:$0xff] }
 0x1db   :  { %762 = vmatpush3.bf16.msra.mxu1 %v803_v60 }
 0x28d   :  { %v490_v61 = vpop.f32.mrb[8].mxu0 }
 0x28e   :  { %v745_v62 = vpop.f32.mrb[9].mxu0 }
 0x28f   :  { %v493_v63 = vpop.f32.mrb[10].mxu0 }
 0x290   :  { %v746_v1 = vpop.f32.mrb[11].mxu0 }
 0x291   :  { %v362_v3 = vpop.f32.mrb[4].mxu1 }
 0x292   :  { %v374_v4 = vmul.f32 %v372_v2, %v362_v3  ;;  %v725_v5 = vpop.f32.mrb[5].mxu1 }
 0x293   :  { %v365_v6 = vpop.f32.mrb[6].mxu1 }
 0x294   :  { %v375_v7 = vpack.c.bf16 %v374_v4, %v374_v4  ;;  %v726_v8 = vpop.f32.mrb[7].mxu1 }
 0x296   :  { %764 = vmatmul.mubr.bf16.vlgmr.msra.gmra.mrb[8].mxu1 %v375_v7 }
 0x369   :  { %v578_v9 = vpop.f32.mrb[8].mxu1 }
 0x36a   :  { %v579_v10 = vadd.f32 %v578_v9, %v490_v61  ;;  %v765_v11 = vpop.f32.mrb[9].mxu1 }
 0x36b   :  { %v581_v12 = vpop.f32.mrb[10].mxu1 }
 0x36c   :  { %v591_v13 = vadd.f32 %v634_v0, %v579_v10  ;;  %v766_v14 = vpop.f32.mrb[11].mxu1 }
 0x36e   :  { %v592_v15 = vmax.f32 %v591_v13, 0.0 }
 0x370   :  { %593 = vst [vmem:[%s1047_s11] sm:$0xff] %v592_v15 }

</bundles_post_ra>
